<compile_context>
chip_gen: v5e
topology: v5e:2x2
jax: 0.10.0
libtpu: 0.0.40
codegen_flags: <defaults>
</compile_context>

<pallas_src>
import jax
import jax.numpy as jnp
from jax.experimental import pallas as pl
from jax.experimental.pallas import tpu as pltpu

EPS = 1e-5
K = 7          # conv kernel size
PAD = 3        # conv spatial padding


def spatial_gate_kernel(xpad_ref, wmat_ref, g_ref, b_ref, out_ref):
    # xpad_ref: (C, N, Hp, Wp)  zero-padded input, channels outermost
    # wmat_ref: (2*K*Wp, W)     banded conv-weight matrix (1/C already folded
    #                           into the "mean" channel band)
    # g_ref:    (1, 1)          BatchNorm gamma
    # b_ref:    (1, 1)          BatchNorm beta
    # out_ref:  (N*H, W)
    C, N, Hp, Wp = xpad_ref.shape
    H = Hp - (K - 1)
    W = Wp - (K - 1)

    xp = xpad_ref[...]                                   # (C, N, Hp, Wp)

    # --- ChannelPool: max over C and sum over C (mean's 1/C is in wmat) -----
    cmax = xp[0]
    csum = xp[0]
    for c in range(1, C):
        cmax = jnp.maximum(cmax, xp[c])
        csum = csum + xp[c]

    # --- banded im2col: the 7x7 conv as ONE matmul --------------------------
    # lhs[(n*H + y), (c*K + dy)*Wp + j] = pooled_pad[c][n, y + dy, j]
    # Channel order matches torch.cat: channel 0 = max, channel 1 = mean(sum).
    slabs = []
    for plane in (cmax, csum):
        for dy in range(K):
            slabs.append(plane[:, dy:dy + H, :])         # (N, H, Wp)
    lhs = jnp.concatenate(slabs, axis=2)                 # (N, H, 2*K*Wp)
    lhs = lhs.reshape(N * H, 2 * K * Wp)                 # free view (H % 8 == 0)

    conv = jnp.dot(lhs, wmat_ref[...],
                   preferred_element_type=jnp.float32)   # (N*H, W)
    # Conv bias intentionally omitted: cancelled exactly by the BN mean
    # subtraction below (single output channel, training-mode statistics).

    # --- BatchNorm2d(1), training mode, one-pass stats ----------------------
    inv_cnt = 1.0 / float(N * H * W)
    s = jnp.sum(conv, keepdims=True)                     # (1, 1)
    ss = jnp.sum(conv * conv, keepdims=True)             # (1, 1)
    mean = s * inv_cnt
    var = ss * inv_cnt - mean * mean
    scale = g_ref[...] * jax.lax.rsqrt(var + EPS)        # (1, 1)
    shift = b_ref[...] - mean * scale                    # (1, 1)
    y = conv * scale + shift                             # (N*H, W)

    # --- gate: out * sigmoid(out) --------------------------------------------
    sig = 1.0 / (1.0 + jnp.exp(-y))
    out_ref[...] = y * sig


def spatial_gate(x_nchw, params):
    w, b, gamma, beta = params           # w: (2, K, K), b/gamma/beta: (1,)
    del b                                # cancelled by training-mode BatchNorm
    N, C, H, W = x_nchw.shape
    Wp = W + 2 * PAD

    # Channels-outermost layout + host-side zero pad.  Padding x spatially is
    # identical to padding the pooled tensor (max/mean over C of zeros is 0).
    xpad = jnp.pad(
        jnp.transpose(x_nchw, (1, 0, 2, 3)).astype(jnp.float32),
        ((0, 0), (0, 0), (PAD, PAD), (PAD, PAD)))        # (C, N, H+6, W+6)

    # Fold the channel-mean's 1/C into the "mean" channel weights so the
    # kernel can consume the raw channel sum.
    w_eff = w.astype(jnp.float32) * jnp.array([1.0, 1.0 / C],
                                              jnp.float32).reshape(2, 1, 1)

    # Banded weight matrix: wmat[(c*K + dy)*Wp + j, x] = w_eff[c, dy, j - x]
    # for 0 <= j - x < K, else 0.  (Pure reshaping of the conv weights.)
    dxm = jnp.arange(Wp)[:, None] - jnp.arange(W)[None, :]        # (Wp, W)
    valid = (dxm >= 0) & (dxm < K)
    taps = w_eff[:, :, jnp.clip(dxm, 0, K - 1)]                   # (2,K,Wp,W)
    wmat = jnp.where(valid[None, None], taps, 0.0).reshape(2 * K * Wp, W)

    vmem = pl.BlockSpec(memory_space=pltpu.MemorySpace.VMEM)
    out_flat = pl.pallas_call(
        spatial_gate_kernel,
        out_shape=jax.ShapeDtypeStruct((N * H, W), jnp.float32),
        in_specs=[vmem, vmem, vmem, vmem],
        out_specs=vmem,
    )(xpad, wmat,
      gamma.reshape(1, 1).astype(jnp.float32),
      beta.reshape(1, 1).astype(jnp.float32))

    return out_flat.reshape(N, 1, H, W)                  # NCHW, Cout = 1


def reference(x_nchw, params):
    # Pure-JAX reference of the PyTorch module (training-mode BN).
    w, b, gamma, beta = params
    pooled = jnp.concatenate(
        [jnp.max(x_nchw, axis=1, keepdims=True),
         jnp.mean(x_nchw, axis=1, keepdims=True)], axis=1)        # (N, 2, H, W)
    w_hwio = jnp.transpose(w, (1, 2, 0))[..., None]               # (K, K, 2, 1)
    y = jax.lax.conv_general_dilated(
        pooled, w_hwio, window_strides=(1, 1),
        padding=((PAD, PAD), (PAD, PAD)),
        dimension_numbers=('NCHW', 'HWIO', 'NCHW')) + b.reshape(1, 1, 1, 1)
    mean = jnp.mean(y, axis=(0, 2, 3), keepdims=True)
    var = jnp.mean((y - mean) ** 2, axis=(0, 2, 3), keepdims=True)
    y = (y - mean) * jax.lax.rsqrt(var + EPS)
    y = y * gamma.reshape(1, -1, 1, 1) + beta.reshape(1, -1, 1, 1)
    return y * jax.nn.sigmoid(y)


if __name__ == "__main__":
    N, C, H, W = 2, 4, 16, 16

    key = jax.random.PRNGKey(0)
    kx, kw, kb, kg, kbe = jax.random.split(key, 5)
    x = jax.random.normal(kx, (N, C, H, W), jnp.float32)
    w = 0.1 * jax.random.normal(kw, (2, K, K), jnp.float32)   # Conv2d(2,1,7)
    b = 0.05 * jax.random.normal(kb, (1,), jnp.float32)
    gamma = 1.0 + 0.1 * jax.random.normal(kg, (1,), jnp.float32)
    beta = 0.1 * jax.random.normal(kbe, (1,), jnp.float32)
    params = (w, b, gamma, beta)

    out = jax.block_until_ready(spatial_gate(x, params))
    ref = jax.block_until_ready(reference(x, params))

    assert out.shape == (N, 1, H, W)
    err = jnp.max(jnp.abs(out - ref))
    assert jnp.allclose(out, ref, rtol=1e-4, atol=1e-4), f"max abs err {err}"

    print("KERNEL_OK")
</pallas_src>

<mosaic_0001>
module attributes {stable_mosaic.version = 11 : i64} {
  func.func @spatial_gate_kernel(%arg0: memref<4x2x22x22xf32, #tpu.memory_space<vmem>>, %arg1: memref<308x16xf32, #tpu.memory_space<vmem>>, %arg2: memref<1x1xf32, #tpu.memory_space<vmem>>, %arg3: memref<1x1xf32, #tpu.memory_space<vmem>>, %arg4: memref<32x16xf32, #tpu.memory_space<vmem>>) attributes {dimension_semantics = [], scalar_prefetch = 0 : i64, scratch_operands = 0 : i64, tpu.core_type = #tpu.core_type<tc>} {
    %c0 = arith.constant 0 : index
    %c0_0 = arith.constant 0 : index
    %c0_1 = arith.constant 0 : index
    %c0_2 = arith.constant 0 : index
    %0 = vector.load %arg0[%c0, %c0_0, %c0_1, %c0_2] : memref<4x2x22x22xf32, #tpu.memory_space<vmem>>, vector<4x2x22x22xf32>
    %1 = vector.extract_strided_slice %0 {offsets = [0, 0, 0, 0], sizes = [1, 2, 22, 22], strides = [1, 1, 1, 1]} : vector<4x2x22x22xf32> to vector<1x2x22x22xf32>
    %2 = vector.shape_cast %1 : vector<1x2x22x22xf32> to vector<2x22x22xf32>
    %3 = vector.extract_strided_slice %0 {offsets = [0, 0, 0, 0], sizes = [1, 2, 22, 22], strides = [1, 1, 1, 1]} : vector<4x2x22x22xf32> to vector<1x2x22x22xf32>
    %4 = vector.shape_cast %3 : vector<1x2x22x22xf32> to vector<2x22x22xf32>
    %5 = vector.extract_strided_slice %0 {offsets = [1, 0, 0, 0], sizes = [1, 2, 22, 22], strides = [1, 1, 1, 1]} : vector<4x2x22x22xf32> to vector<1x2x22x22xf32>
    %6 = vector.shape_cast %5 : vector<1x2x22x22xf32> to vector<2x22x22xf32>
    %7 = arith.maximumf %2, %6 : vector<2x22x22xf32>
    %8 = vector.extract_strided_slice %0 {offsets = [1, 0, 0, 0], sizes = [1, 2, 22, 22], strides = [1, 1, 1, 1]} : vector<4x2x22x22xf32> to vector<1x2x22x22xf32>
    %9 = vector.shape_cast %8 : vector<1x2x22x22xf32> to vector<2x22x22xf32>
    %10 = arith.addf %4, %9 : vector<2x22x22xf32>
    %11 = vector.extract_strided_slice %0 {offsets = [2, 0, 0, 0], sizes = [1, 2, 22, 22], strides = [1, 1, 1, 1]} : vector<4x2x22x22xf32> to vector<1x2x22x22xf32>
    %12 = vector.shape_cast %11 : vector<1x2x22x22xf32> to vector<2x22x22xf32>
    %13 = arith.maximumf %7, %12 : vector<2x22x22xf32>
    %14 = vector.extract_strided_slice %0 {offsets = [2, 0, 0, 0], sizes = [1, 2, 22, 22], strides = [1, 1, 1, 1]} : vector<4x2x22x22xf32> to vector<1x2x22x22xf32>
    %15 = vector.shape_cast %14 : vector<1x2x22x22xf32> to vector<2x22x22xf32>
    %16 = arith.addf %10, %15 : vector<2x22x22xf32>
    %17 = vector.extract_strided_slice %0 {offsets = [3, 0, 0, 0], sizes = [1, 2, 22, 22], strides = [1, 1, 1, 1]} : vector<4x2x22x22xf32> to vector<1x2x22x22xf32>
    %18 = vector.shape_cast %17 : vector<1x2x22x22xf32> to vector<2x22x22xf32>
    %19 = arith.maximumf %13, %18 : vector<2x22x22xf32>
    %20 = vector.extract_strided_slice %0 {offsets = [3, 0, 0, 0], sizes = [1, 2, 22, 22], strides = [1, 1, 1, 1]} : vector<4x2x22x22xf32> to vector<1x2x22x22xf32>
    %21 = vector.shape_cast %20 : vector<1x2x22x22xf32> to vector<2x22x22xf32>
    %22 = arith.addf %16, %21 : vector<2x22x22xf32>
    %23 = vector.extract_strided_slice %19 {offsets = [0, 0, 0], sizes = [2, 16, 22], strides = [1, 1, 1]} : vector<2x22x22xf32> to vector<2x16x22xf32>
    %24 = vector.extract_strided_slice %19 {offsets = [0, 1, 0], sizes = [2, 16, 22], strides = [1, 1, 1]} : vector<2x22x22xf32> to vector<2x16x22xf32>
    %25 = vector.extract_strided_slice %19 {offsets = [0, 2, 0], sizes = [2, 16, 22], strides = [1, 1, 1]} : vector<2x22x22xf32> to vector<2x16x22xf32>
    %26 = vector.extract_strided_slice %19 {offsets = [0, 3, 0], sizes = [2, 16, 22], strides = [1, 1, 1]} : vector<2x22x22xf32> to vector<2x16x22xf32>
    %27 = vector.extract_strided_slice %19 {offsets = [0, 4, 0], sizes = [2, 16, 22], strides = [1, 1, 1]} : vector<2x22x22xf32> to vector<2x16x22xf32>
    %28 = vector.extract_strided_slice %19 {offsets = [0, 5, 0], sizes = [2, 16, 22], strides = [1, 1, 1]} : vector<2x22x22xf32> to vector<2x16x22xf32>
    %29 = vector.extract_strided_slice %19 {offsets = [0, 6, 0], sizes = [2, 16, 22], strides = [1, 1, 1]} : vector<2x22x22xf32> to vector<2x16x22xf32>
    %30 = vector.extract_strided_slice %22 {offsets = [0, 0, 0], sizes = [2, 16, 22], strides = [1, 1, 1]} : vector<2x22x22xf32> to vector<2x16x22xf32>
    %31 = vector.extract_strided_slice %22 {offsets = [0, 1, 0], sizes = [2, 16, 22], strides = [1, 1, 1]} : vector<2x22x22xf32> to vector<2x16x22xf32>
    %32 = vector.extract_strided_slice %22 {offsets = [0, 2, 0], sizes = [2, 16, 22], strides = [1, 1, 1]} : vector<2x22x22xf32> to vector<2x16x22xf32>
    %33 = vector.extract_strided_slice %22 {offsets = [0, 3, 0], sizes = [2, 16, 22], strides = [1, 1, 1]} : vector<2x22x22xf32> to vector<2x16x22xf32>
    %34 = vector.extract_strided_slice %22 {offsets = [0, 4, 0], sizes = [2, 16, 22], strides = [1, 1, 1]} : vector<2x22x22xf32> to vector<2x16x22xf32>
    %35 = vector.extract_strided_slice %22 {offsets = [0, 5, 0], sizes = [2, 16, 22], strides = [1, 1, 1]} : vector<2x22x22xf32> to vector<2x16x22xf32>
    %36 = vector.extract_strided_slice %22 {offsets = [0, 6, 0], sizes = [2, 16, 22], strides = [1, 1, 1]} : vector<2x22x22xf32> to vector<2x16x22xf32>
    %37 = tpu.concatenate %23, %24, %25, %26, %27, %28, %29, %30, %31, %32, %33, %34, %35, %36 in 2 : vector<2x16x22xf32>, vector<2x16x22xf32>, vector<2x16x22xf32>, vector<2x16x22xf32>, vector<2x16x22xf32>, vector<2x16x22xf32>, vector<2x16x22xf32>, vector<2x16x22xf32>, vector<2x16x22xf32>, vector<2x16x22xf32>, vector<2x16x22xf32>, vector<2x16x22xf32>, vector<2x16x22xf32>, vector<2x16x22xf32> -> vector<2x16x308xf32>
    %38 = vector.shape_cast %37 : vector<2x16x308xf32> to vector<32x308xf32>
    %c0_3 = arith.constant 0 : index
    %c0_4 = arith.constant 0 : index
    %39 = vector.load %arg1[%c0_3, %c0_4] : memref<308x16xf32, #tpu.memory_space<vmem>>, vector<308x16xf32>
    %cst = arith.constant dense<0.000000e+00> : vector<32x16xf32>
    %40 = tpu.matmul %38, %39, %cst {dimension_numbers = #tpu.dot_dimension_numbers<[1], [0], [0], [1], [0, 0, 1, 1], [], []>} : vector<32x308xf32>, vector<308x16xf32>, vector<32x16xf32> -> vector<32x16xf32>
    %41 = vector.shape_cast %40 : vector<32x16xf32> to vector<1x32x16xf32>
    %cst_5 = arith.constant dense<0.000000e+00> : vector<1xf32>
    %42 = vector.multi_reduction <add>, %41, %cst_5 [1, 2] : vector<1x32x16xf32> to vector<1xf32>
    %43 = vector.shape_cast %42 : vector<1xf32> to vector<1x1x1xf32>
    %44 = vector.extract %43[0, 0, 0] : f32 from vector<1x1x1xf32>
    %45 = vector.broadcast %44 : f32 to vector<1x1xf32>
    %46 = arith.mulf %40, %40 : vector<32x16xf32>
    %47 = vector.shape_cast %46 : vector<32x16xf32> to vector<1x32x16xf32>
    %cst_6 = arith.constant dense<0.000000e+00> : vector<1xf32>
    %48 = vector.multi_reduction <add>, %47, %cst_6 [1, 2] : vector<1x32x16xf32> to vector<1xf32>
    %49 = vector.shape_cast %48 : vector<1xf32> to vector<1x1x1xf32>
    %50 = vector.extract %49[0, 0, 0] : f32 from vector<1x1x1xf32>
    %51 = vector.broadcast %50 : f32 to vector<1x1xf32>
    %cst_7 = arith.constant 0.001953125 : f32
    %52 = vector.broadcast %cst_7 : f32 to vector<1x1xf32>
    %53 = arith.mulf %45, %52 : vector<1x1xf32>
    %cst_8 = arith.constant 0.001953125 : f32
    %54 = vector.broadcast %cst_8 : f32 to vector<1x1xf32>
    %55 = arith.mulf %51, %54 : vector<1x1xf32>
    %56 = arith.mulf %53, %53 : vector<1x1xf32>
    %57 = arith.subf %55, %56 : vector<1x1xf32>
    %c0_9 = arith.constant 0 : index
    %c0_10 = arith.constant 0 : index
    %58 = vector.load %arg2[%c0_9, %c0_10] : memref<1x1xf32, #tpu.memory_space<vmem>>, vector<1x1xf32>
    %cst_11 = arith.constant 9.99999974E-6 : f32
    %59 = vector.broadcast %cst_11 : f32 to vector<1x1xf32>
    %60 = arith.addf %57, %59 : vector<1x1xf32>
    %61 = math.rsqrt %60 : vector<1x1xf32>
    %62 = arith.mulf %58, %61 : vector<1x1xf32>
    %c0_12 = arith.constant 0 : index
    %c0_13 = arith.constant 0 : index
    %63 = vector.load %arg3[%c0_12, %c0_13] : memref<1x1xf32, #tpu.memory_space<vmem>>, vector<1x1xf32>
    %64 = arith.mulf %53, %62 : vector<1x1xf32>
    %65 = arith.subf %63, %64 : vector<1x1xf32>
    %66 = vector.broadcast %62 : vector<1x1xf32> to vector<32x16xf32>
    %67 = arith.mulf %40, %66 : vector<32x16xf32>
    %68 = vector.broadcast %65 : vector<1x1xf32> to vector<32x16xf32>
    %69 = arith.addf %67, %68 : vector<32x16xf32>
    %cst_14 = arith.constant 0.000000e+00 : f32
    %70 = vector.broadcast %cst_14 : f32 to vector<32x16xf32>
    %71 = arith.subf %70, %69 : vector<32x16xf32>
    %72 = math.exp %71 : vector<32x16xf32>
    %cst_15 = arith.constant 1.000000e+00 : f32
    %73 = vector.broadcast %cst_15 : f32 to vector<32x16xf32>
    %74 = arith.addf %73, %72 : vector<32x16xf32>
    %cst_16 = arith.constant 1.000000e+00 : f32
    %75 = vector.broadcast %cst_16 : f32 to vector<32x16xf32>
    %76 = arith.divf %75, %74 : vector<32x16xf32>
    %77 = arith.mulf %69, %76 : vector<32x16xf32>
    %c0_17 = arith.constant 0 : index
    %c0_18 = arith.constant 0 : index
    %78 = vector.load %arg4[%c0_17, %c0_18] : memref<32x16xf32, #tpu.memory_space<vmem>>, vector<32x16xf32>
    tpu.vector_store %arg4[%c0_17, %c0_18], %77 {strides = array<i32>} : memref<32x16xf32, #tpu.memory_space<vmem>>, vector<32x16xf32>,
    return
  }
}

</mosaic_0001>

<bundles_post_ra>
// kernel: tpu_custom_call.1
= control target key start
LH: loop header
LB: loop body
LE: loop exit
PB: predicated region body
PF: predicated region fallthrough
CT: control target
= control target key end

     0   :  { %vm156_vm0 = vcmask 1043456   ;;  %vm179_vm1 = vcmask 1042432   ;;  %s893_s17 = smov 26   ;;  %s894_s22 = smov 114   ;;  %vm202_vm2 = vcmask 1041408   ;;  %vm110_vm3 = vcmask 1045504   ;;  %s1573_s0 = inlined_call_operand.vmem [shape: f32[4,2,22,22], index: 0, kind: input, shape index: {}]   ;;  %s1574_s1 = inlined_call_operand.vmem [shape: f32[308,16], index: 1, kind: input, shape index: {}]   ;;  %s1575_s2 = inlined_call_operand.<no memory space> [shape: f32[1,1], index: 2, kind: input, shape index: {}]   ;;  %s1576_s3 = inlined_call_operand.<no memory space> [shape: f32[1,1], index: 3, kind: input, shape index: {}]   ;;  %s1577_s4 = inlined_call_operand.vmem [shape: f32[32,16], index: 4, kind: output, shape index: {}]  }
   0x1   :  { %v21_v0 = vld [vmem:[%s1573_s0] sm:$0xff]  ;;  %v22_v1 = vld [vmem:[%s1573_s0 + $0x8] sm:$0xff]  ;;  %v27_v2 = vld [vmem:[%s1573_s0 + $0x30] sm:$0xff]  ;;  %s895_s5 = smov 110   ;;  %vm87_vm4 = vcmask 1046528   ;;  %s896_s6 = smov 30  }
   0x2   :  { %v28_v3 = vld [vmem:[%s1573_s0 + $0x38] sm:$0xff]  ;;  %v33_v4 = vld [vmem:[%s1573_s0 + $0x60] sm:$0xff]  ;;  %v34_v5 = vld [vmem:[%s1573_s0 + $0x68] sm:$0xff]  ;;  %v51_v6 = vadd.f32 %v27_v2, %v21_v0  ;;  %v45_v7 = vmax.f32 %v21_v0, %v27_v2  ;;  %s897_s7 = smov 8   ;;  %vm133_vm5 = vcmask 1044480   ;;  %s898_s8 = smov 4  }
   0x3   :  { %v39_v8 = vld [vmem:[%s1573_s0 + $0x90] sm:$0xff]  ;;  %v46_v9 = vmax.f32 %v22_v1, %v28_v3  ;;  %v52_v10 = vadd.f32 %v28_v3, %v22_v1  ;;  %v40_v12 = vld [vmem:[%s1573_s0 + $0x98] sm:$0xff]  ;;  %v29_v15 = vld [vmem:[%s1573_s0 + $0x40] sm:$0x3f]  ;;  %s899_s13 = smov 70   ;;  %s900_s14 = smov 22  }
   0x4   :  { %v23_v11 = vld [vmem:[%s1573_s0 + $0x10] sm:$0x3f]  ;;  %v63_v13 = vadd.f32 %v51_v6, %v33_v4  ;;  %v57_v14 = vmax.f32 %v45_v7, %v33_v4  ;;  %v41_v23 = vld [vmem:[%s1573_s0 + $0xa0] sm:$0x3f]  ;;  %v979_v27 = vld [vmem:[%s1573_s0 + $0x18] sm:$0xff]  ;;  %s901_s18 = smov 48  }
   0x5   :  { %v35_v16 = vld [vmem:[%s1573_s0 + $0x70] sm:$0x3f]  ;;  %v58_v17 = vmax.f32 %v46_v9, %v34_v5  ;;  %v64_v18 = vadd.f32 %v52_v10, %v34_v5  ;;  %v47_v19 = vmax.f32 %v23_v11, %v29_v15  ;;  %v53_v20 = vadd.f32 %v29_v15, %v23_v11  ;;  %v984_v28 = vld [vmem:[%s1573_s0 + $0x48] sm:$0xff]  ;;  %v1008_v43 = vld [vmem:[%s1573_s0 + $0x20] sm:$0xff]  ;;  %s902_s21 = smov 66   ;;  %s903_s23 = smov 92  }
   0x6   :  { %v965_v21 = vadd.f32 %v63_v13, %v39_v8  ;;  %v967_v22 = vmax.f32 %v57_v14, %v39_v8  ;;  %v48_v38 = vmax.f32 %v979_v27, %v984_v28  ;;  %v1013_v44 = vld [vmem:[%s1573_s0 + $0x50] sm:$0xff]  ;;  %v1023_v48 = vld [vmem:[%s1573_s0 + $0x78] sm:$0xff]  ;;  %v1031_v52 = vld [vmem:[%s1573_s0 + $0x80] sm:$0xff]  ;;  %s905_s24 = smov 88   ;;  %vm430_vm6 = vcmask 64512  }
   0x7   :  { %v972_v24 = vmax.f32 %v58_v17, %v40_v12  ;;  %v974_v25 = vadd.f32 %v64_v18, %v40_v12  ;;  %v59_v26 = vmax.f32 %v47_v19, %v35_v16  ;;  %v65_v30 = vadd.f32 %v53_v20, %v35_v16  ;;  %v1036_v54 = vld [vmem:[%s1573_s0 + $0xa8] sm:$0xff]  ;;  %v1048_v59 = vld [vmem:[%s1573_s0 + $0xb0] sm:$0xff] }
   0x8   :  { %v309_v29 = vrot.slane %v965_v21, 4  ;;  %v180_v31 = vrot.slane %v967_v22, 5  ;;  %v353_v36 = vrot.slane %v965_v21, 6  ;;  %v203_v41 = vrot.slane %v967_v22, 6 }
   0x9   :  { %v788_v32 = vpack.i.bf16 %v974_v25, %v965_v21  ;;  %v310_v33 = vrot.slane %v974_v25, 4  ;;  %v991_v34 = vmax.f32 %v59_v26, %v41_v23  ;;  %v181_v35 = vrot.slane %v972_v24, 5 }
   0xa   :  { %v354_v37 = vrot.slane %v974_v25, 6  ;;  %v204_v42 = vrot.slane %v972_v24, 6  ;;  %v1016_v45 = vadd.f32 %v65_v30, %v41_v23  ;;  %v331_v50 = vrot.slane %v965_v21, 5  ;;  %v1092_v30 = vld [vmem:[%s1573_s0 + $0x28] sm:$0x3f] }
   0xb   :  { %789 = vrot.lane.b32.xlu2 %v788_v32, %s893_s17  ;;  %v311_v39 = vsel %vm156_vm0, %v309_v29, %v310_v33  ;;  %v183_v40 = vrot.slane %v991_v34, 5  ;;  %v182_v46 = vsel %vm179_vm1, %v180_v31, %v181_v35  ;;  %v206_v47 = vrot.slane %v991_v34, 6 }
   0xc   :  { %319 = vrot.lane.b32.xlu1 %v311_v39, %s894_s22  ;;  %v332_v51 = vrot.slane %v974_v25, 5  ;;  %v49_v55 = vmax.f32 %v1008_v43, %v1013_v44  ;;  %v355_v56 = vsel %vm202_vm2, %v353_v36, %v354_v37  ;;  %v205_v57 = vsel %vm202_vm2, %v203_v41, %v204_v42  ;;  %v1100_v36 = vld [vmem:[%s1573_s0 + $0x58] sm:$0x3f] }
   0xd   :  { %v184_v49 = vsel %vm179_vm1, %v181_v35, %v183_v40  ;;  %v265_v58 = vrot.slane %v965_v21, 2  ;;  %v60_v60 = vmax.f32 %v48_v38, %v1023_v48  ;;  %v207_v61 = vsel %vm202_vm2, %v204_v42, %v206_v47 }
   0xe   :  { %v793_v53 = vpack.i.bf16 %v184_v49, %v182_v46  ;;  %v266_v62 = vrot.slane %v974_v25, 2  ;;  %v268_v63 = vrot.slane %v1016_v45, 2  ;;  %v61_v0 = vmax.f32 %v49_v55, %v1031_v52 }
   0xf   :  { %v333_v1 = vsel %vm179_vm1, %v331_v50, %v332_v51  ;;  %v1060_v2 = vmax.f32 %v60_v60, %v1036_v54  ;;  %v89_v3 = vrot.slane %v972_v24, 1  ;;  %v91_v4 = vrot.slane %v991_v34, 1 }
  0x10   :  { %794 = vrot.lane.b32.xlu0 %v793_v53, %s895_s5  ;;  %v1065_v5 = vmax.f32 %v61_v0, %v1048_v59  ;;  %v798_v6 = vpack.i.bf16 %v207_v61, %v205_v57  ;;  %v243_v8 = vrot.slane %v965_v21, 1  ;;  %v244_v9 = vrot.slane %v974_v25, 1  ;;  %v1121_v53 = vld [vmem:[%s1573_s0 + $0x88] sm:$0x3f]  ;;  %v1134_v61 = vld [vmem:[%s1573_s0 + $0xb8] sm:$0x3f] }
  0x11   :  { %v93_v7 = vrot.slane %v1060_v2, 1  ;;  %v267_v10 = vsel %vm110_vm3, %v265_v58, %v266_v62  ;;  %v269_v11 = vsel %vm110_vm3, %v266_v62, %v268_v63  ;;  %v246_v13 = vrot.slane %v1016_v45, 1  ;;  %s904_s0 = smov 44  }
  0x12   :  { %v94_v12 = vrot.slane %v1065_v5, 1  ;;  %v92_v14 = vsel %vm87_vm4, %v89_v3, %v91_v4  ;;  %v813_v16 = vpack.i.bf16 %v269_v11, %v267_v10  ;;  %v245_v17 = vsel %vm87_vm4, %v243_v8, %v244_v9 }
  0x13   :  { %363 = vrot.lane.b32.xlu2 %v355_v56, %s896_s6  ;;  %v135_v18 = vrot.slane %v972_v24, 3  ;;  %v137_v19 = vrot.slane %v991_v34, 3  ;;  %v247_v23 = vsel %vm87_vm4, %v244_v9, %v246_v13  ;;  %v139_v26 = vrot.slane %v1060_v2, 3 }
  0x14   :  { %341 = vrot.lane.b32.xlu1 %v333_v1, %s897_s7  ;;  %v95_v15 = vsel %vm87_vm4, %v93_v7, %v94_v12  ;;  %v140_v29 = vrot.slane %v1065_v5, 3  ;;  %v287_v31 = vrot.slane %v965_v21, 3  ;;  %v288_v32 = vrot.slane %v974_v25, 3 }
  0x15   :  { %v808_v20 = vpack.i.bf16 %v95_v15, %v92_v14  ;;  %v290_v35 = vrot.slane %v1016_v45, 3  ;;  %v803_v38 = vpack.i.bf16 %v247_v23, %v245_v17  ;;  %v138_v39 = vsel %vm133_vm5, %v135_v18, %v137_v19 }
  0x16   :  { %v141_v21 = vsel %vm133_vm5, %v139_v26, %v140_v29  ;;  %v112_v40 = vrot.slane %v972_v24, 2  ;;  %v114_v41 = vrot.slane %v991_v34, 2  ;;  %v50_v42 = vmax.f32 %v1092_v30, %v1100_v36 }
  0x17   :  { %v289_v46 = vsel %vm133_vm5, %v287_v31, %v288_v32  ;;  %v291_v47 = vsel %vm133_vm5, %v288_v32, %v290_v35  ;;  %v116_v49 = vrot.slane %v1060_v2, 2  ;;  %v117_v50 = vrot.slane %v1065_v5, 2 }
  0x18   :  { %799 = vrot.lane.b32.xlu0 %v798_v6, %s898_s8  ;;  %v828_v55 = vpack.i.bf16 %v141_v21, %v138_v39  ;;  %v823_v56 = vpack.i.bf16 %v291_v47, %v289_v46  ;;  %v62_v57 = vmax.f32 %v50_v42, %v1121_v53  ;;  %v115_v58 = vsel %vm110_vm3, %v112_v40, %v114_v41 }
  0x19   :  { %v118_v60 = vsel %vm110_vm3, %v116_v49, %v117_v50  ;;  %v334_v62 = vrot.slane %v1016_v45, 5  ;;  %v312_v63 = vrot.slane %v1016_v45, 4  ;;  %v158_v0 = vrot.slane %v972_v24, 4 }
  0x1a   :  { %v160_v1 = vrot.slane %v991_v34, 4  ;;  %v818_v4 = vpack.i.bf16 %v118_v60, %v115_v58  ;;  %v162_v6 = vrot.slane %v1060_v2, 4  ;;  %v163_v7 = vrot.slane %v1065_v5, 4 }
  0x1b   :  { %814 = vrot.lane.b32.xlu2 %v813_v16, %s899_s13  ;;  %v1145_v8 = vmax.f32 %v62_v57, %v1134_v61  ;;  %v335_v9 = vsel %vm179_vm1, %v332_v51, %v334_v62  ;;  %v313_v10 = vsel %vm156_vm0, %v310_v33, %v312_v63  ;;  %v208_v11 = vrot.slane %v1060_v2, 6 }
  0x1c   :  { %809 = vrot.lane.b32.xlu1 %v808_v20, %s900_s14  ;;  %v161_v34 = vsel %vm156_vm0, %v158_v0, %v160_v1  ;;  %v164_v13 = vsel %vm156_vm0, %v162_v6, %v163_v7  ;;  %v209_v14 = vrot.slane %v1065_v5, 6  ;;  %v185_v15 = vrot.slane %v1060_v2, 5 }
  0x1d   :  { %v211_v51 = vrot.slane %v1145_v8, 6  ;;  %v186_v33 = vrot.slane %v1065_v5, 5  ;;  %v188_v16 = vrot.slane %v1145_v8, 5  ;;  %v54_v17 = vadd.f32 %v984_v28, %v979_v27 }
  0x1e   :  { %v55_v19 = vadd.f32 %v1013_v44, %v1008_v43  ;;  %v833_v20 = vpack.i.bf16 %v164_v13, %v161_v34  ;;  %v210_v23 = vsel %vm202_vm2, %v208_v11, %v209_v14  ;;  %v356_v44 = vrot.slane %v1016_v45, 6 }
  0x1f   :  { %v212_v26 = vsel %vm202_vm2, %v209_v14, %v211_v51  ;;  %v187_v31 = vsel %vm179_vm1, %v185_v15, %v186_v33  ;;  %v189_v32 = vsel %vm179_vm1, %v186_v33, %v188_v16  ;;  %v66_v35 = vadd.f32 %v54_v17, %v1023_v48 }
  0x20   :  { %804 = vrot.lane.b32.xlu0 %v803_v38, %s901_s18  ;;  %v67_v27 = vadd.f32 %v55_v19, %v1031_v52  ;;  %v843_v28 = vpack.i.bf16 %v212_v26, %v210_v23  ;;  %v838_v43 = vpack.i.bf16 %v189_v32, %v187_v31  ;;  %v357_v48 = vsel %vm202_vm2, %v354_v37, %v356_v44  ;;  %v471_v23 = vld [vmem:[%s1574_s1 + $0xf8] sm:$0xff]  ;;  %v478_v26 = vld [vmem:[%s1574_s1 + $0x130] sm:$0xf]  ;;  %v476_v44 = vld [vmem:[%s1574_s1 + $0x120] sm:$0xff] }
  0x21   :  { %v78_v38 = vadd.f32 %v66_v35, %v1036_v54  ;;  %v88_v45 = vrot.slane %v967_v22, 1  ;;  %v96_v54 = vrot.slane %v1145_v8, 1  ;;  %v56_v58 = vadd.f32 %v1100_v36, %v1092_v30  ;;  %524 = vmatpush.msra.mxu1 %v471_v23  ;;  %749 = vmatpush.msk.msra.mxu2 %vm156_vm0, %v478_v26 }
  0x22   :  { %v1182_v39 = vadd.f32 %v67_v27, %v1048_v59  ;;  %v111_v62 = vrot.slane %v967_v22, 2  ;;  %v157_v13 = vrot.slane %v967_v22, 4  ;;  %v165_v14 = vrot.slane %v1145_v8, 4  ;;  %v470_v27 = vld [vmem:[%s1574_s1 + $0xf0] sm:$0xff] }
  0x23   :  { %829 = vrot.lane.b32.xlu2 %v828_v55, %s902_s21  ;;  %v336_v52 = vrot.slane %v78_v38, 5  ;;  %v314_v42 = vrot.slane %v78_v38, 4  ;;  %v90_v37 = vsel %vm87_vm4, %v88_v45, %v89_v3  ;;  %v97_v46 = vsel %vm87_vm4, %v94_v12, %v96_v54  ;;  %525 = vmatpush.msra.mxu1 %v470_v27 }
  0x24   :  { %824 = vrot.lane.b32.xlu1 %v823_v56, %s903_s23  ;;  %v337_v21 = vrot.slane %v1182_v39, 5  ;;  %v848_v41 = vpack.i.bf16 %v1182_v39, %v78_v38  ;;  %v315_v25 = vrot.slane %v1182_v39, 4  ;;  %v248_v49 = vrot.slane %v78_v38, 1 }
  0x25   :  { %v249_v55 = vrot.slane %v1182_v39, 1  ;;  %v853_v56 = vpack.i.bf16 %v90_v37, %v97_v46  ;;  %v358_v57 = vrot.slane %v78_v38, 6  ;;  %v359_v3 = vrot.slane %v1182_v39, 6  ;;  %v454_v37 = vld [vmem:[%s1574_s1 + $0x70] sm:$0xff]  ;;  %v465_v46 = vld [vmem:[%s1574_s1 + $0xc8] sm:$0xff] }
  0x26   :  { %v338_v59 = vsel %vm179_vm1, %v336_v52, %v337_v21  ;;  %v316_v47 = vsel %vm156_vm0, %v314_v42, %v315_v25  ;;  %v119_v12 = vrot.slane %v1145_v8, 2  ;;  %v292_v63 = vrot.slane %v78_v38, 3  ;;  %v475_v52 = vld [vmem:[%s1574_s1 + $0x118] sm:$0xff]  ;;  %v466_v42 = vld [vmem:[%s1574_s1 + $0xd0] sm:$0xff] }
  0x27   :  { %v250_v60 = vsel %vm87_vm4, %v248_v49, %v249_v55  ;;  %v293_v1 = vrot.slane %v1182_v39, 3  ;;  %v360_v6 = vsel %vm202_vm2, %v358_v57, %v359_v3  ;;  %v113_v30 = vsel %vm110_vm3, %v111_v62, %v112_v40  ;;  %v453_v49 = vld [vmem:[%s1574_s1 + $0x68] sm:$0xff]  ;;  %v452_v57 = vld [vmem:[%s1574_s1 + $0x60] sm:$0xff]  ;;  %v450_v62 = vld [vmem:[%s1574_s1 + $0x50] sm:$0xff] }
  0x28   :  { %819 = vrot.lane.b32.xlu0 %v818_v4, %s904_s0  ;;  %v68_v4 = vadd.f32 %v56_v58, %v1121_v53  ;;  %v120_v36 = vsel %vm110_vm3, %v117_v50, %v119_v12  ;;  %v271_v34 = vrot.slane %v1182_v39, 2  ;;  %v134_v51 = vrot.slane %v967_v22, 3  ;;  %v463_v58 = vld [vmem:[%s1574_s1 + $0xb8] sm:$0xff]  ;;  %v461_v12 = vld [vmem:[%s1574_s1 + $0xa8] sm:$0xff] }
  0x29   :  { %v858_v11 = vpack.i.bf16 %v113_v30, %v120_v36  ;;  %v142_v15 = vrot.slane %v1145_v8, 3  ;;  %v159_v33 = vsel %vm156_vm0, %v157_v13, %v158_v0  ;;  %v459_v30 = vld [vmem:[%s1574_s1 + $0x98] sm:$0xff]  ;;  %vm435_vm7 = vcmask 244736  }
  0x2a   :  { %v80_v53 = vadd.f32 %v68_v4, %v1134_v61  ;;  %v166_v61 = vsel %vm156_vm0, %v163_v7, %v165_v14  ;;  %v136_v19 = vsel %vm133_vm5, %v134_v51, %v135_v18  ;;  %v447_v36 = vld [vmem:[%s1574_s1 + $0x38] sm:$0xff]  ;;  %v444_v14 = vld [vmem:[%s1574_s1 + $0x20] sm:$0xff]  ;;  %v442_v51 = vld [vmem:[%s1574_s1 + $0x10] sm:$0xff]  ;;  %vm479_vm8 = vcmask 424960  }
  0x2b   :  { %343 = vrot.lane.b32.xlu2 %v335_v9, %s897_s7  ;;  %v294_v9 = vsel %vm133_vm5, %v292_v63, %v293_v1  ;;  %v868_v17 = vpack.i.bf16 %v159_v33, %v166_v61  ;;  %v143_v8 = vsel %vm133_vm5, %v140_v29, %v142_v15  ;;  %v449_v63 = vld [vmem:[%s1574_s1 + $0x48] sm:$0xff]  ;;  %v440_v61 = vld [vmem:[%s1574_s1] sm:$0xff]  ;;  %vm400_vm9 = vcmask 31744  }
  0x2c   :  { %321 = vrot.lane.b32.xlu1 %v313_v10, %s894_s22  ;;  %v270_v10 = vrot.slane %v78_v38, 2  ;;  %v317_v50 = vrot.slane %v80_v53, 4  ;;  %v863_v0 = vpack.i.bf16 %v136_v19, %v143_v8  ;;  %v361_v7 = vrot.slane %v80_v53, 6  ;;  %v441_v33 = vld [vmem:[%s1574_s1 + $0x8] sm:$0xff] }
  0x2d   :  { %v339_v29 = vrot.slane %v80_v53, 5  ;;  %v295_v35 = vrot.slane %v80_v53, 3  ;;  %v273_v38 = vrot.slane %v80_v53, 2  ;;  %vm405_vm10 = vcmask 211968  }
  0x2e   :  { %v272_v40 = vsel %vm110_vm3, %v270_v10, %v271_v34  ;;  %v318_v16 = vsel %vm156_vm0, %v315_v25, %v317_v50  ;;  %v362_v31 = vsel %vm202_vm2, %v359_v3, %v361_v7  ;;  %v473_v25 = vld [vmem:[%s1574_s1 + $0x108] sm:$0xff]  ;;  %v462_v3 = vld [vmem:[%s1574_s1 + $0xb0] sm:$0xff]  ;;  %v443_v50 = vld [vmem:[%s1574_s1 + $0x18] sm:$0xff]  ;;  %vm410_vm11 = vcmask 392192  }
  0x2f   :  { %v340_v32 = vsel %vm179_vm1, %v337_v21, %v339_v29  ;;  %v296_v39 = vsel %vm133_vm5, %v293_v1, %v295_v35  ;;  %v467_v21 = vld [vmem:[%s1574_s1 + $0xd8] sm:$0xff]  ;;  %v274_v54 = vsel %vm110_vm3, %v271_v34, %v273_v38  ;;  %v460_v1 = vld [vmem:[%s1574_s1 + $0xa0] sm:$0xff]  ;;  %v446_v10 = vld [vmem:[%s1574_s1 + $0x30] sm:$0xff]  ;;  %vm415_vm12 = vcmask 572416  }
  0x30   :  { %834 = vrot.lane.b32.xlu0 %v833_v20, %s905_s24  ;;  %v251_v20 = vrot.slane %v80_v53, 1  ;;  %v457_v34 = vld [vmem:[%s1574_s1 + $0x88] sm:$0xff]  ;;  %v456_v53 = vld [vmem:[%s1574_s1 + $0x80] sm:$0xff]  ;;  %vm420_vm13 = vcmask 752640   ;;  %vm425_vm14 = vcmask 932864   ;;  %vm375_vm15 = vcmask 179200  }
  0x31   :  { %vm380_vm0 = vcmask 359424   ;;  %vm385_vm1 = vcmask 539648   ;;  %vm390_vm2 = vcmask 719872   ;;  %vm395_vm3 = vcmask 900096  }
  0x32   :  { %v252_v18 = vsel %vm87_vm4, %v249_v55, %v251_v20  ;;  %v464_v55 = vld [vmem:[%s1574_s1 + $0xc0] sm:$0xff]  ;;  %vm582_vm4 = vcmask 130048  }
  0x33   :  { %844 = vrot.lane.b32.xlu2 %v843_v28, %s898_s8  ;;  %v477_v28 = vld [vmem:[%s1574_s1 + $0x128] sm:$0xff] }
  0x34   :  { %839 = vrot.lane.b32.xlu1 %v838_v43, %s895_s5  ;;  %v469_v43 = vld [vmem:[%s1574_s1 + $0xe8] sm:$0xff]  ;;  %563 = vmatpush.msra.mxu2 %v477_v28 }
  0x35   :  { %526 = vmatpush.msra.mxu1 %v469_v43 }
  0x36   :  { %564 = vmatpush.msra.mxu2 %v476_v44 }
  0x38   :  { %365 = vrot.lane.b32.xlu0 %v357_v48, %s896_s6  ;;  %v468_v48 = vld [vmem:[%s1574_s1 + $0xe0] sm:$0xff]  ;;  %565 = vmatpush.msra.mxu2 %v475_v52 }
  0x39   :  { %527 = vmatpush.msra.mxu1 %v468_v48 }
  0x3b   :  { %849 = vrot.lane.b32.xlu2 %v848_v41, %s893_s17  ;;  %v474_v41 = vld [vmem:[%s1574_s1 + $0x110] sm:$0xff]  ;;  %528 = vmatpush.msra.mxu1 %v467_v21 }
  0x3c   :  { %345 = vrot.lane.b32.xlu1 %v338_v59, %s897_s7  ;;  %v455_v59 = vld [vmem:[%s1574_s1 + $0x78] sm:$0xff]  ;;  %566 = vmatpush.msra.mxu2 %v474_v41 }
  0x3d   :  { %754 = vmatpush.msra.mxu3 %v455_v59  ;;  %495 = vmatpush.msra.mxu0 %v455_v59 }
  0x3e   :  { %529 = vmatpush.msra.mxu1 %v466_v42  ;;  %567 = vmatpush.msra.mxu2 %v473_v25 }
  0x3f   :  { %755 = vmatpush.msra.mxu3 %v454_v37  ;;  %496 = vmatpush.msra.mxu0 %v454_v37 }
  0x40   :  { %323 = vrot.lane.b32.xlu0 %v316_v47, %s894_s22  ;;  %v472_v47 = vld [vmem:[%s1574_s1 + $0x100] sm:$0xff]  ;;  %530 = vmatpush.msra.mxu1 %v465_v46 }
  0x41   :  { %568 = vmatpush.msra.mxu2 %v472_v47  ;;  %756 = vmatpush.msra.mxu3 %v453_v49 }
  0x42   :  { %531 = vmatpush.msra.mxu1 %v464_v55  ;;  %497 = vmatpush.msra.mxu0 %v453_v49 }
  0x43   :  { %854 = vrot.lane.b32.xlu2 %v853_v56, %s900_s14  ;;  %757 = vmatpush.msra.mxu3 %v452_v57 }
  0x44   :  { %257 = vrot.lane.b32.xlu1 %v250_v60, %s901_s18  ;;  %532 = vmatpush.msra.mxu1 %v463_v58  ;;  %v451_v60 = vld [vmem:[%s1574_s1 + $0x58] sm:$0xff] }
  0x45   :  { %498 = vmatpush.msra.mxu0 %v452_v57  ;;  %758 = vmatpush.msra.mxu3 %v451_v60 }
  0x46   :  { %533 = vmatpush.msra.mxu1 %v462_v3 }
  0x47   :  { %499 = vmatpush.msra.mxu0 %v451_v60  ;;  %759 = vmatpush.msra.mxu3 %v450_v62 }
  0x48   :  { %367 = vrot.lane.b32.xlu0 %v360_v6, %s896_s6  ;;  %534 = vmatpush.msra.mxu1 %v461_v12  ;;  %v448_v6 = vld [vmem:[%s1574_s1 + $0x40] sm:$0xff] }
  0x49   :  { %500 = vmatpush.msra.mxu0 %v450_v62  ;;  %760 = vmatpush.msra.mxu3 %v449_v63 }
  0x4a   :  { %535 = vmatpush.msra.mxu1 %v460_v1 }
  0x4b   :  { %301 = vrot.lane.b32.xlu2 %v294_v9, %s903_s23  ;;  %501 = vmatpush.msra.mxu0 %v449_v63  ;;  %v458_v9 = vld [vmem:[%s1574_s1 + $0x90] sm:$0xff] }
  0x4c   :  { %859 = vrot.lane.b32.xlu1 %v858_v11, %s904_s0  ;;  %761 = vmatpush.msra.mxu3 %v448_v6  ;;  %v445_v11 = vld [vmem:[%s1574_s1 + $0x28] sm:$0xff] }
  0x4d   :  { %536 = vmatpush.msra.mxu1 %v459_v30  ;;  %502 = vmatpush.msra.mxu0 %v448_v6 }
  0x4e   :  { %762 = vmatpush.msra.mxu3 %v447_v36 }
  0x4f   :  { %537 = vmatpush.msra.mxu1 %v458_v9  ;;  %503 = vmatpush.msra.mxu0 %v447_v36 }
  0x50   :  { %279 = vrot.lane.b32.xlu0 %v272_v40, %s899_s13  ;;  %763 = vmatpush.msra.mxu3 %v446_v10 }
  0x51   :  { %538 = vmatpush.msra.mxu1 %v457_v34  ;;  %504 = vmatpush.msra.mxu0 %v446_v10 }
  0x52   :  { %764 = vmatpush.msra.mxu3 %v445_v11 }
  0x53   :  { %325 = vrot.lane.b32.xlu2 %v318_v16, %s894_s22  ;;  %539 = vmatpush.msra.mxu1 %v456_v53 }
  0x54   :  { %869 = vrot.lane.b32.xlu1 %v868_v17, %s905_s24  ;;  %505 = vmatpush.msra.mxu0 %v445_v11 }
  0x55   :  { %765 = vmatpush.msra.mxu3 %v444_v14 }
  0x56   :  { %506 = vmatpush.msra.mxu0 %v444_v14 }
  0x57   :  { %766 = vmatpush.msra.mxu3 %v443_v50 }
  0x58   :  { %864 = vrot.lane.b32.xlu0 %v863_v0, %s902_s21  ;;  %507 = vmatpush.msra.mxu0 %v443_v50 }
  0x59   :  { %767 = vmatpush.msra.mxu3 %v442_v51 }
  0x5a   :  { %508 = vmatpush.msra.mxu0 %v442_v51 }
  0x5b   :  { %259 = vrot.lane.b32.xlu2 %v252_v18, %s901_s18  ;;  %768 = vmatpush.msra.mxu3 %v441_v33 }
  0x5c   :  { %369 = vrot.lane.b32.xlu1 %v362_v31, %s896_s6  ;;  %509 = vmatpush.msra.mxu0 %v441_v33 }
  0x5d   :  { %769 = vmatpush.msra.mxu3 %v440_v61 }
  0x5e   :  { %510 = vmatpush.msra.mxu0 %v440_v61 }
  0x60   :  { %347 = vrot.lane.b32.xlu0 %v340_v32, %s897_s7 }
  0x64   :  { %303 = vrot.lane.b32.xlu1 %v296_v39, %s903_s23 }
  0x65   :  { %v1295_v45 = vpop.permute.xlu2 %789 }
  0x66   :  { %v791_v29 = vunpack.i.l.bf16 %v1295_v45  ;;  %v792_v59 = vunpack.i.h.bf16 %v1295_v45 }
  0x68   :  { %281 = vrot.lane.b32.xlu0 %v274_v54, %s899_s13 }
  0x6d   :  { %v1323_v56 = vpop.permute.xlu2 %363 }
  0x75   :  { %v1349_v4 = vpop.permute.xlu2 %814 }
  0x76   :  { %v816_v35 = vunpack.i.l.bf16 %v1349_v4  ;;  %v817_v37 = vunpack.i.h.bf16 %v1349_v4 }
  0x7d   :  { %v1375_v13 = vpop.permute.xlu2 %829 }
  0x7e   :  { %v320_v40 = vpop.permute.xlu1 %319  ;;  %v831_v45 = vunpack.i.l.bf16 %v1375_v13 }
  0x82   :  { %v1386_v15 = vpop.permute.xlu0 %794 }
  0x83   :  { %v796_v26 = vunpack.i.l.bf16 %v1386_v15  ;;  %v797_v39 = vunpack.i.h.bf16 %v1386_v15 }
  0x85   :  { %v1394_v16 = vpop.permute.xlu2 %343 }
  0x86   :  { %v342_v17 = vpop.permute.xlu1 %341 }
  0x87   :  { %v431_v19 = vsel %vm430_vm6, %v320_v40, %v342_v17 }
  0x88   :  { %v436_v8 = vsel %vm435_vm7, %v431_v19, %v1323_v56 }
  0x89   :  { %750 = vmatmul.msk.f32.vlgmr.msra.gmra.mxu2 %vm479_vm8, %v436_v8 }
  0x8a   :  { %v800_v0 = vpop.permute.xlu0 %799 }
  0x8b   :  { %v801_v20 = vunpack.i.l.bf16 %v800_v0  ;;  %v802_v28 = vunpack.i.h.bf16 %v800_v0 }
  0x8d   :  { %v1400_v7 = vpop.permute.xlu2 %844  ;;  %v401_v18 = vsel %vm400_vm9, %v796_v26, %v801_v20  ;;  %v402_v21 = vsel %vm400_vm9, %v797_v39, %v802_v28 }
  0x8e   :  { %v1402_v23 = vpop.permute.xlu1 %809  ;;  %v406_v27 = vsel %vm405_vm10, %v401_v18, %v791_v29  ;;  %v407_v47 = vsel %vm405_vm10, %v402_v21, %v792_v59 }
  0x8f   :  { %v811_v46 = vunpack.i.l.bf16 %v1402_v23  ;;  %v812_v6 = vunpack.i.h.bf16 %v1402_v23 }
  0x91   :  { %v377_v60 = vsel %vm375_vm15, %v972_v24, %v811_v46  ;;  %v847_v24 = vunpack.i.h.bf16 %v1400_v7  ;;  %v378_v50 = vsel %vm375_vm15, %v1060_v2, %v812_v6 }
  0x92   :  { %v805_v31 = vpop.permute.xlu0 %804 }
  0x93   :  { %v806_v32 = vunpack.i.l.bf16 %v805_v31  ;;  %v807_v41 = vunpack.i.h.bf16 %v805_v31 }
  0x95   :  { %v411_v43 = vsel %vm410_vm11, %v406_v27, %v806_v32  ;;  %v1412_v44 = vpop.permute.xlu2 %849  ;;  %v412_v49 = vsel %vm410_vm11, %v407_v47, %v807_v41  ;;  %v846_v27 = vunpack.i.l.bf16 %v1400_v7 }
  0x96   :  { %v825_v38 = vpop.permute.xlu1 %824  ;;  %v416_v52 = vsel %vm415_vm12, %v411_v43, %v816_v35  ;;  %v417_v3 = vsel %vm415_vm12, %v412_v49, %v817_v37  ;;  %v852_v34 = vunpack.i.h.bf16 %v1412_v44 }
  0x97   :  { %v826_v48 = vunpack.i.l.bf16 %v825_v38  ;;  %v827_v55 = vunpack.i.h.bf16 %v825_v38 }
  0x99   :  { %v421_v54 = vsel %vm420_vm13, %v416_v52, %v826_v48  ;;  %v422_v12 = vsel %vm420_vm13, %v417_v3, %v827_v55 }
  0x9a   :  { %v820_v42 = vpop.permute.xlu0 %819  ;;  %v426_v25 = vsel %vm425_vm14, %v421_v54, %v320_v40  ;;  %v832_v40 = vunpack.i.h.bf16 %v1375_v13 }
  0x9b   :  { %540 = vmatmul.f32.vlgmr.msra.gmra.mxu1 %v426_v25  ;;  %v821_v56 = vunpack.i.l.bf16 %v820_v42  ;;  %v822_v36 = vunpack.i.h.bf16 %v820_v42 }
  0x9d   :  { %v1424_v57 = vpop.permute.xlu2 %854  ;;  %v382_v62 = vsel %vm380_vm0, %v377_v60, %v821_v56  ;;  %v383_v51 = vsel %vm380_vm0, %v378_v50, %v822_v36 }
  0x9e   :  { %v322_v58 = vpop.permute.xlu1 %321  ;;  %v387_v30 = vsel %vm385_vm1, %v382_v62, %v831_v45  ;;  %v388_v13 = vsel %vm385_vm1, %v383_v51, %v832_v40  ;;  %v857_v42 = vunpack.i.h.bf16 %v1424_v57  ;;  %v856_v25 = vunpack.i.l.bf16 %v1424_v57 }
  0x9f   :  { %v427_v1 = vsel %vm425_vm14, %v422_v12, %v322_v58  ;;  %v432_v17 = vsel %vm430_vm6, %v322_v58, %v1394_v16 }
  0xa0   :  { %v376_v49 = vsel %vm375_vm15, %v967_v22, %v857_v42  ;;  %v379_v55 = vsel %vm375_vm15, %v1065_v5, %v856_v25 }
  0xa2   :  { %v835_v63 = vpop.permute.xlu0 %834 }
  0xa3   :  { %v836_v4 = vunpack.i.l.bf16 %v835_v63  ;;  %543 = vmatmul.f32.gmra.mxu1 %v427_v1  ;;  %v837_v33 = vunpack.i.h.bf16 %v835_v63 }
  0xa5   :  { %v392_v9 = vsel %vm390_vm2, %v387_v30, %v836_v4  ;;  %v302_v10 = vpop.permute.xlu2 %301  ;;  %v393_v2 = vsel %vm390_vm2, %v388_v13, %v837_v33 }
  0xa6   :  { %v397_v11 = vsel %vm395_vm3, %v392_v9, %v797_v39  ;;  %v840_v53 = vpop.permute.xlu1 %839  ;;  %v851_v39 = vunpack.i.l.bf16 %v1412_v44 }
  0xa7   :  { %514 = vmatmul.f32.vlgmr.msra.gmra.mxu3 %v397_v11  ;;  %v842_v14 = vunpack.i.h.bf16 %v840_v53  ;;  %v841_v19 = vunpack.i.l.bf16 %v840_v53 }
  0xa9   :  { %v404_v61 = vsel %vm400_vm9, %v842_v14, %v847_v24  ;;  %v398_v18 = vsel %vm395_vm3, %v393_v2, %v841_v19  ;;  %v403_v48 = vsel %vm400_vm9, %v841_v19, %v846_v27 }
  0xaa   :  { %v366_v8 = vpop.permute.xlu0 %365  ;;  %v409_v0 = vsel %vm405_vm10, %v404_v61, %v852_v34  ;;  %v408_v21 = vsel %vm405_vm10, %v403_v48, %v851_v39 }
  0xab   :  { %v437_v20 = vsel %vm435_vm7, %v432_v17, %v366_v8 }
  0xac   :  { %751 = vmatmul.msk.f32.gmra.mxu2 %vm479_vm8, %v437_v20 }
  0xad   :  { %v326_v23 = vpop.permute.xlu2 %325 }
  0xae   :  { %v346_v29 = vpop.permute.xlu1 %345 }
  0xaf   :  { %517 = vmatmul.f32.gmra.mxu3 %v398_v18 }
  0xb2   :  { %v324_v31 = vpop.permute.xlu0 %323 }
  0xb3   :  { %v433_v28 = vsel %vm430_vm6, %v324_v31, %v346_v29 }
  0xb5   :  { %v260_v32 = vpop.permute.xlu2 %259 }
  0xb6   :  { %v414_v16 = vsel %vm410_vm11, %v409_v0, %v260_v32  ;;  %v258_v35 = vpop.permute.xlu1 %257 }
  0xb7   :  { %v413_v41 = vsel %vm410_vm11, %v408_v21, %v258_v35 }
  0xba   :  { %v368_v43 = vpop.permute.xlu0 %367 }
  0xbb   :  { %v438_v38 = vsel %vm435_vm7, %v433_v28, %v368_v43 }
  0xbc   :  { %752 = vmatmul.msk.f32.gmra.mxu2 %vm479_vm8, %v438_v38 }
  0xbe   :  { %v860_v52 = vpop.permute.xlu1 %859 }
  0xbf   :  { %v862_v46 = vunpack.i.h.bf16 %v860_v52  ;;  %v861_v47 = vunpack.i.l.bf16 %v860_v52 }
  0xc1   :  { %v381_v62 = vsel %vm380_vm0, %v376_v49, %v862_v46  ;;  %v384_v57 = vsel %vm380_vm0, %v379_v55, %v861_v47 }
  0xc2   :  { %v280_v54 = vpop.permute.xlu0 %279 }
  0xc3   :  { %v418_v59 = vsel %vm415_vm12, %v413_v41, %v280_v54 }
  0xc4   :  { %v423_v7 = vsel %vm420_vm13, %v418_v59, %v302_v10 }
  0xc5   :  { %v428_v37 = vsel %vm425_vm14, %v423_v7, %v324_v31 }
  0xc6   :  { %546 = vmatmul.f32.gmra.mxu1 %v428_v37  ;;  %v870_v44 = vpop.permute.xlu1 %869 }
  0xc7   :  { %v872_v58 = vunpack.i.h.bf16 %v870_v44  ;;  %v871_v45 = vunpack.i.l.bf16 %v870_v44 }
  0xca   :  { %v865_v56 = vpop.permute.xlu0 %864 }
  0xcb   :  { %v867_v60 = vunpack.i.h.bf16 %v865_v56  ;;  %v866_v3 = vunpack.i.l.bf16 %v865_v56 }
  0xcd   :  { %v386_v12 = vsel %vm385_vm1, %v381_v62, %v867_v60  ;;  %v389_v63 = vsel %vm385_vm1, %v384_v57, %v866_v3 }
  0xce   :  { %v391_v1 = vsel %vm390_vm2, %v386_v12, %v872_v58  ;;  %v394_v22 = vsel %vm390_vm2, %v389_v63, %v871_v45  ;;  %v370_v6 = vpop.permute.xlu1 %369 }
  0xcf   :  { %v396_v5 = vsel %vm395_vm3, %v391_v1, %v796_v26  ;;  %v399_v4 = vsel %vm395_vm3, %v394_v22, %v842_v14  ;;  %v9_v22 = vstv %s1575_s2 }
  0xd0   :  { %511 = vmatmul.f32.vlgmr.msra.gmra.mxu0 %v396_v5  ;;  %520 = vmatmul.f32.gmra.mxu3 %v399_v4  ;;  %10 = vst [vmem:[#allocation2] sm:$0x1] %v9_v22  ;;  %v11_v5 = vstv %s1576_s3  ;;  %v906_v4 = vmov 0  }
  0xd1   :  { %873 = vset.pattern.permute.xlu1 %v906_v4  ;;  %12 = vst [vmem:[#allocation3] sm:$0x1] %v11_v5  ;;  %874 = vset.pattern.permute.xlu0 %v906_v4 }
  0xd2   :  { %v348_v30 = vpop.permute.xlu0 %347 }
  0xd3   :  { %v434_v24 = vsel %vm430_vm6, %v326_v23, %v348_v30 }
  0xd4   :  { %v439_v36 = vsel %vm435_vm7, %v434_v24, %v370_v6 }
  0xd5   :  { %753 = vmatmul.msk.f32.gmra.mxu2 %vm479_vm8, %v439_v36 }
  0xd6   :  { %v304_v9 = vpop.permute.xlu1 %303 }
  0xda   :  { %v282_v10 = vpop.permute.xlu0 %281 }
  0xdb   :  { %v419_v34 = vsel %vm415_vm12, %v414_v16, %v282_v10 }
  0xdc   :  { %v424_v15 = vsel %vm420_vm13, %v419_v34, %v304_v9 }
  0xdd   :  { %v429_v26 = vsel %vm425_vm14, %v424_v15, %v326_v23 }
  0xde   :  { %549 = vmatmul.f32.gmra.mxu1 %v429_v26 }
 0x10c   :  { %v570_v53 = vpop.f32.mrf.mxu2 }
 0x118   :  { %v541_v11 = vpop.f32.mrf.mxu1 }
 0x120   :  { %v544_v14 = vpop.f32.mrf.mxu1 }
 0x12a   :  { %v515_v40 = vpop.f32.mrf.mxu3 }
 0x12b   :  { %v545_v17 = vadd.f32 %v544_v14, %v515_v40  ;;  %v625_v40 = vld [vmem:[#allocation2] sm:$0x1] }
 0x12f   :  { %v573_v50 = vpop.f32.mrf.mxu2 }
 0x130   :  { %v1488_v0 = vadd.f32 %v573_v50, %v545_v17 }
 0x132   :  { %v518_v8 = vpop.f32.mrf.mxu3  ;;  %v601_v23 = vmul.f32 %v1488_v0, %v1488_v0  ;;  %v584_v31 = vsel %vm582_vm4, %v1488_v0, 0.0 }
 0x134   :  { %v605_v38 = vsel %vm582_vm4, %v601_v23, 0.0 }
 0x13f   :  { %v576_v13 = vpop.f32.mrf.mxu2 }
 0x143   :  { %v547_v61 = vpop.f32.mrf.mxu1 }
 0x144   :  { %v548_v20 = vadd.f32 %v547_v61, %v518_v8  ;;  %v638_v8 = vld [vmem:[#allocation3] sm:$0x1] }
 0x146   :  { %v1494_v18 = vadd.f32 %v576_v13, %v548_v20 }
 0x148   :  { %v602_v43 = vmul.f32 %v1494_v18, %v1494_v18  ;;  %v586_v21 = vsel %vm582_vm4, %v1494_v18, 0.0 }
 0x14a   :  { %v607_v7 = vsel %vm582_vm4, %v602_v43, 0.0 }
 0x14d   :  { %v512_v51 = vpop.f32.mrf.mxu0 }
 0x14e   :  { %v542_v33 = vadd.f32 %v541_v11, %v512_v51 }
 0x150   :  { %v1486_v19 = vadd.f32 %v570_v53, %v542_v33 }
 0x152   :  { %v600_v2 = vmul.f32 %v1486_v19, %v1486_v19  ;;  %v583_v29 = vsel %vm582_vm4, %v1486_v19, 0.0 }
 0x153   :  { %v521_v16 = vpop.f32.mrf.mxu3  ;;  %v585_v27 = vadd.f32 %v584_v31, %v583_v29 }
 0x154   :  { %v604_v32 = vsel %vm582_vm4, %v600_v2, 0.0 }
 0x155   :  { %v606_v48 = vadd.f32 %v605_v38, %v604_v32  ;;  %v587_v41 = vadd.f32 %v586_v21, %v585_v27 }
 0x157   :  { %v608_v25 = vadd.f32 %v607_v7, %v606_v48 }
 0x158   :  { %v579_v39 = vpop.f32.mrf.mxu2 }
 0x15b   :  { %v550_v35 = vpop.f32.mrf.mxu1 }
 0x15c   :  { %v551_v28 = vadd.f32 %v550_v35, %v521_v16 }
 0x15e   :  { %v1504_v52 = vadd.f32 %v579_v39, %v551_v28 }
 0x160   :  { %v588_v54 = vsel %vm582_vm4, %v1504_v52, 0.0  ;;  %v603_v59 = vmul.f32 %v1504_v52, %v1504_v52 }
 0x161   :  { %v589_v42 = vadd.f32 %v588_v54, %v587_v41 }
 0x162   :  { %v609_v37 = vsel %vm582_vm4, %v603_v59, 0.0 }
 0x163   :  { %590 = vadd.xlane.f32.xlu2 %v589_v42  ;;  %v610_v44 = vadd.f32 %v609_v37, %v608_v25 }
 0x165   :  { %611 = vadd.xlane.f32.xlu0 %v610_v44 }
 0x1d6   :  { %v591_v46 = vpop.xlane.xlu2 %590 }
 0x1d7   :  { %v592_v47 = vrot.slane %v591_v46, 4 }
 0x1d8   :  { %v612_v49 = vpop.xlane.xlu0 %611 }
 0x1d9   :  { %v593_v55 = vadd.f32 %v592_v47, %v591_v46  ;;  %v613_v56 = vrot.slane %v612_v49, 4 }
 0x1db   :  { %v594_v58 = vrot.slane %v593_v55, 2  ;;  %v614_v45 = vadd.f32 %v613_v56, %v612_v49 }
 0x1dd   :  { %v615_v60 = vrot.slane %v614_v45, 2  ;;  %v595_v3 = vadd.f32 %v594_v58, %v593_v55 }
 0x1df   :  { %v616_v62 = vadd.f32 %v615_v60, %v614_v45  ;;  %v596_v57 = vrot.slane %v595_v3, 1 }
 0x1e1   :  { %v597_v12 = vadd.f32 %v596_v57, %v595_v3  ;;  %v617_v63 = vrot.slane %v616_v62, 1 }
 0x1e3   :  { %770 = vpush %v597_v12  ;;  %v618_v1 = vadd.f32 %v617_v63, %v616_v62 }
 0x1e5   :  { %772 = vpush %v618_v1 }
 0x214   :  { %s771_s25 = spop %770 }
 0x215   :  { %v599_v6 = vstv %s771_s25 }
 0x216   :  { %v621_v30 = vmul.f32 0.001953125, %v599_v6  ;;  %s773_s26 = spop %772 }
 0x217   :  { %v620_v24 = vstv %s773_s26 }
 0x218   :  { %v623_v36 = vmul.f32 %v621_v30, %v621_v30  ;;  %v622_v9 = vmul.f32 0.001953125, %v620_v24 }
 0x21a   :  { %v624_v10 = vsub.f32 %v622_v9, %v623_v36 }
 0x21c   :  { %v626_v34 = vadd.f32 1e-05, %v624_v10 }
 0x21e   :  { %875 = vrsqrt.f32 %v626_v34  ;;  %vm633_vm6 = vweird.f32 %v626_v34 }
 0x224   :  { %v876_v15 = vpop.eup %875 }
 0x225   :  { %v628_v26 = vmul.f32 %v876_v15, %v626_v34  ;;  %vm634_vm5 = vweird.f32 %v876_v15 }
 0x226   :  { %vm635_vm7 = vmor %vm633_vm6, %vm634_vm5 }
 0x227   :  { %v629_v11 = vmul.f32 %v876_v15, %v628_v26 }
 0x229   :  { %v630_v53 = vmul.f32 0.5, %v629_v11 }
 0x22b   :  { %v631_v14 = vsub.f32 1.5, %v630_v53 }
 0x22d   :  { %v632_v50 = vmul.f32 %v876_v15, %v631_v14 }
 0x22f   :  { %v636_v51 = vsel %vm635_vm7, %v876_v15, %v632_v50 }
 0x230   :  { %v637_v33 = vmul.f32 %v636_v51, %v625_v40 }
 0x232   :  { %v642_v61 = vperm.slane %v637_v33, 0  ;;  %v639_v17 = vmul.f32 %v637_v33, %v621_v30 }
 0x234   :  { %644 = vperm.xlu1 %873, %v642_v61   ;;  %v640_v20 = vsub.f32 %v638_v8, %v639_v17 }
 0x236   :  { %v652_v13 = vperm.slane %v640_v20, 0 }
 0x23c   :  { %654 = vperm.xlu1 %873, %v652_v13  }
 0x2a6   :  { %v645_v2 = vpop.permute.xlu1 %644 }
 0x2a7   :  { %v647_v23 = vmul.f32 %v645_v2, %v1486_v19  ;;  %v648_v29 = vmul.f32 %v645_v2, %v1488_v0  ;;  %v649_v31 = vmul.f32 %v645_v2, %v1494_v18  ;;  %v650_v32 = vmul.f32 %v645_v2, %v1504_v52 }
 0x2ae   :  { %v655_v16 = vpop.permute.xlu1 %654 }
 0x2af   :  { %v1524_v35 = vadd.f32 %v655_v16, %v647_v23  ;;  %v1526_v27 = vadd.f32 %v655_v16, %v648_v29  ;;  %v1528_v28 = vadd.f32 %v655_v16, %v649_v31  ;;  %v1530_v43 = vadd.f32 %v655_v16, %v650_v32 }
 0x2b1   :  { %v661_v38 = vsub.f32 0.0, %v1524_v35  ;;  %v662_v39 = vsub.f32 0.0, %v1526_v27  ;;  %v663_v19 = vsub.f32 0.0, %v1528_v28  ;;  %v664_v0 = vsub.f32 0.0, %v1530_v43 }
 0x2b3   :  { %v665_v18 = vmul.f32 1.442695, %v661_v38  ;;  %v667_v48 = vmul.f32 1.442695, %v662_v39  ;;  %v669_v52 = vmul.f32 1.442695, %v663_v19 }
 0x2b4   :  { %v671_v21 = vmul.f32 1.442695, %v664_v0 }
 0x2b5   :  { %877 = vpow2.f32 %v665_v18 }
 0x2b6   :  { %879 = vpow2.f32 %v667_v48 }
 0x2b7   :  { %881 = vpow2.f32 %v669_v52 }
 0x2b8   :  { %883 = vpow2.f32 %v671_v21 }
 0x2bb   :  { %v878_v41 = vpop.eup %877 }
 0x2bc   :  { %v880_v54 = vpop.eup %879  ;;  %v673_v59 = vadd.f32 1.0, %v878_v41 }
 0x2bd   :  { %v882_v7 = vpop.eup %881  ;;  %v674_v42 = vadd.f32 1.0, %v880_v54 }
 0x2be   :  { %v884_v25 = vpop.eup %883  ;;  %v675_v37 = vadd.f32 1.0, %v882_v7  ;;  %885 = vrcp.f32 %v673_v59  ;;  %v686_v46 = vand.u32 2147483647, %v673_v59  ;;  %v688_v47 = vand.u32 2147483648, %v673_v59 }
 0x2bf   :  { %v676_v44 = vadd.f32 1.0, %v884_v25  ;;  %887 = vrcp.f32 %v674_v42  ;;  %vm682_vm8 = vweird.f32 %v673_v59  ;;  %vm697_vm9 = vweird.f32 %v674_v42 }
 0x2c0   :  { %889 = vrcp.f32 %v675_v37  ;;  %v701_v60 = vand.u32 2147483647, %v674_v42  ;;  %v703_v3 = vand.u32 2147483648, %v674_v42  ;;  %vm1536_vm10 = vcmp.eq.f32.partialorder %v686_v46, 8.507059e+37 }
 0x2c1   :  { %891 = vrcp.f32 %v676_v44  ;;  %v689_v12 = vor.u32 1.1754944e-38, %v688_v47  ;;  %vm712_vm11 = vweird.f32 %v675_v37  ;;  %v716_v5 = vand.u32 2147483647, %v675_v37 }
 0x2c2   :  { %v718_v4 = vand.u32 2147483648, %v675_v37  ;;  %vm1540_vm14 = vcmp.eq.f32.partialorder %v701_v60, 8.507059e+37  ;;  %v704_v10 = vor.u32 1.1754944e-38, %v703_v3  ;;  %vm727_vm1 = vweird.f32 %v676_v44 }
 0x2c3   :  { %v731_v53 = vand.u32 2147483647, %v676_v44  ;;  %v733_v14 = vand.u32 2147483648, %v676_v44  ;;  %vm717_vm6 = vcmp.eq.f32.partialorder %v716_v5, 8.507059e+37 }
 0x2c4   :  { %v886_v49 = vpop.eup %885  ;;  %v719_v17 = vor.u32 1.1754944e-38, %v718_v4 }
 0x2c5   :  { %v888_v55 = vpop.eup %887  ;;  %v678_v56 = vmul.f32 %v886_v49, %v673_v59  ;;  %vm683_vm12 = vweird.f32 %v886_v49  ;;  %v734_v29 = vor.u32 1.1754944e-38, %v733_v14 }
 0x2c6   :  { %v890_v58 = vpop.eup %889  ;;  %v693_v45 = vmul.f32 %v888_v55, %v674_v42  ;;  %vm698_vm13 = vweird.f32 %v888_v55  ;;  %vm684_vm0 = vmor %vm682_vm8, %vm683_vm12  ;;  %vm732_vm8 = vcmp.eq.f32.partialorder %v731_v53, 8.507059e+37 }
 0x2c7   :  { %v679_v62 = vsub.f32 1.0, %v678_v56  ;;  %v708_v63 = vmul.f32 %v890_v58, %v675_v37  ;;  %v892_v1 = vpop.eup %891  ;;  %vm713_vm15 = vweird.f32 %v890_v58  ;;  %vm699_vm2 = vmor %vm697_vm9, %vm698_vm13 }
 0x2c8   :  { %v694_v22 = vsub.f32 1.0, %v693_v45  ;;  %v723_v24 = vmul.f32 %v892_v1, %v676_v44  ;;  %vm728_vm3 = vweird.f32 %v892_v1  ;;  %vm714_vm5 = vmor %vm712_vm11, %vm713_vm15 }
 0x2c9   :  { %v680_v6 = vmul.f32 %v886_v49, %v679_v62  ;;  %v709_v30 = vsub.f32 1.0, %v708_v63  ;;  %vm729_vm7 = vmor %vm727_vm1, %vm728_vm3 }
 0x2ca   :  { %v695_v36 = vmul.f32 %v888_v55, %v694_v22  ;;  %v724_v26 = vsub.f32 1.0, %v723_v24 }
 0x2cb   :  { %v681_v34 = vadd.f32 %v886_v49, %v680_v6  ;;  %v710_v15 = vmul.f32 %v890_v58, %v709_v30 }
 0x2cc   :  { %v696_v11 = vadd.f32 %v888_v55, %v695_v36  ;;  %v725_v51 = vmul.f32 %v892_v1, %v724_v26 }
 0x2cd   :  { %v685_v40 = vsel %vm684_vm0, %v886_v49, %v681_v34  ;;  %v711_v50 = vadd.f32 %v890_v58, %v710_v15 }
 0x2ce   :  { %v690_v33 = vsel %vm1536_vm10, %v689_v12, %v685_v40  ;;  %v700_v61 = vsel %vm699_vm2, %v888_v55, %v696_v11  ;;  %v726_v13 = vadd.f32 %v892_v1, %v725_v51 }
 0x2cf   :  { %v705_v8 = vsel %vm1540_vm14, %v704_v10, %v700_v61  ;;  %v715_v20 = vsel %vm714_vm5, %v890_v58, %v711_v50  ;;  %v737_v2 = vmul.f32 %v690_v33, %v1524_v35 }
 0x2d0   :  { %v720_v23 = vsel %vm717_vm6, %v719_v17, %v715_v20  ;;  %v738_v31 = vmul.f32 %v705_v8, %v1526_v27  ;;  %v730_v32 = vsel %vm729_vm7, %v892_v1, %v726_v13 }
 0x2d1   :  { %v739_v16 = vmul.f32 %v720_v23, %v1528_v28  ;;  %741 = vst.msk [vmem:[%s1577_s4] sm:$0xff] %vm582_vm4, %v737_v2  ;;  %v735_v38 = vsel %vm732_vm8, %v734_v29, %v730_v32 }
 0x2d2   :  { %742 = vst.msk [vmem:[%s1577_s4 + $0x8] sm:$0xff] %vm582_vm4, %v738_v31  ;;  %v740_v35 = vmul.f32 %v735_v38, %v1530_v43 }
 0x2d3   :  { %743 = vst.msk [vmem:[%s1577_s4 + $0x10] sm:$0xff] %vm582_vm4, %v739_v16 }
 0x2d4   :  { %744 = vst.msk [vmem:[%s1577_s4 + $0x18] sm:$0xff] %vm582_vm4, %v740_v35 }

</bundles_post_ra>
